<compile_context>
chip_gen: v6e
topology: v6e:2x2x1
jax: 0.10.0
libtpu: 0.0.40
codegen_flags: <defaults>
</compile_context>

<pallas_src>
import jax
import jax.numpy as jnp
import numpy as np
from jax.experimental import pallas as pl
from jax.experimental.pallas import tpu as pltpu


def _sublane_multiple(dtype):
    # 4-byte -> 8, 2-byte -> 16 sublane alignment.
    return max(8, 32 // jnp.dtype(dtype).itemsize)


def _vmem_budget():
    """(tile+M byte budget, vmem_limit_bytes) sized to the chip's VMEM."""
    try:
        phys = int(pltpu.get_tpu_info().vmem_capacity_bytes)
    except Exception:
        phys = 64 * 1024 * 1024  # assume the tightest (v7x) if query fails
    if phys > 64 * 1024 * 1024:  # v5e / v6e: 128 MiB physical -> bigger tiles
        return 48 * 1024 * 1024, 64 * 1024 * 1024
    return 24 * 1024 * 1024, 32 * 1024 * 1024  # v7x: 64 MiB physical


def _pick_pack(H, W, S, itemsize, m_budget_bytes):
    """Pick G (divisor of H): number of input rows packed into one kernel row.

    Preference (lexicographic):
      1. K = G*W multiple of 128  (lane-dense input loads, full MXU rows)
      2. N = K*S*S multiple of 128 (unmasked lane-dense output stores)
      3. N >= 128
    subject to K <= k_cap so the K-MACs-per-output matmul stays under the HBM
    roofline on all generations and M = (K, N) stays small in VMEM.
    """
    k_cap_mxu = 512 // itemsize                       # 128 for f32, 256 for bf16
    k_cap_m = int((m_budget_bytes / (S * S * itemsize)) ** 0.5)
    k_cap = max(W, min(k_cap_mxu, k_cap_m))           # G=1 always allowed
    best = None
    for g in range(1, H + 1):
        if H % g:
            continue
        K = g * W
        if K > k_cap and g > 1:
            continue
        N = K * S * S
        score = (K % 128 == 0, N % 128 == 0, N >= 128, -abs(K - 128), g)
        if best is None or score > best[0]:
            best = (score, g)
    return best[1]


def _pick_block_rows(R, align, row_bytes, budget_bytes):
    """Largest divisor of R whose block fits the VMEM budget, is sublane
    aligned (or the full dim), preferring >= 2 grid steps (v7x megacore)."""
    cap = max(1, budget_bytes // max(1, row_bytes))
    divs = [d for d in range(1, R + 1) if R % d == 0 and (d % align == 0 or d == R)]
    within = [d for d in divs if d <= cap] or [min(divs)]
    multi = [d for d in within if R // d >= 2]
    return max(multi) if multi else max(within)


def _upsample_kernel(x_ref, m_ref, o_ref):
    # Exact 0/1 selection matmul (one 1 per column of M): every output element
    # is exactly one input element.  M is a constant-index input, resident in
    # VMEM across all grid steps -- no per-step iota / div / mod work.
    o_ref[...] = jnp.dot(x_ref[...], m_ref[...],
                         preferred_element_type=o_ref.dtype)


def upsample(x, stride=2):
    """Pallas equivalent of the PyTorch Upsample module (nearest, integer factor)."""
    assert x.ndim == 4
    B, C, H, W = map(int, x.shape)
    S = int(stride)
    if S == 1:
        return x
    # Selection-matmul path is exact for f32 / bf16 only.
    # TODO(synk): integer / fp16 dtypes would need a copy/store-based path.
    assert x.dtype in (jnp.float32, jnp.bfloat16), x.dtype

    itemsize = jnp.dtype(x.dtype).itemsize
    tile_budget, vmem_limit = _vmem_budget()

    G = _pick_pack(H, W, S, itemsize, m_budget_bytes=tile_budget // 3)
    K = G * W                     # packed input row width  (lanes)
    N = K * S * S                 # packed output row width (lanes)
    R = B * C * (H // G)          # number of packed rows

    # Build the 0/1 selection matrix once on the host (trace-time constant).
    # Output lane l -> (output row in group ro = l // (W*S), output col
    # oj = l % (W*S)); its source is input lane (ro // S) * W + oj // S.
    ws = W * S
    l = np.arange(N)
    src = (l // ws // S) * W + (l % ws) // S
    m = jnp.asarray(np.arange(K)[:, None] == src[None, :], dtype=x.dtype)

    m_bytes = 2 * K * N * itemsize           # assume it gets double-buffered
    row_bytes = 2 * (K + N) * itemsize       # double-buffered in + out tiles
    TR = _pick_block_rows(R, _sublane_multiple(x.dtype), row_bytes,
                          max(row_bytes, tile_budget - m_bytes))

    x2 = x.reshape(R, K)                     # free reshape of contiguous NCHW

    out2 = pl.pallas_call(
        _upsample_kernel,
        out_shape=jax.ShapeDtypeStruct((R, N), x.dtype),
        grid=(R // TR,),
        in_specs=[
            pl.BlockSpec((TR, K), lambda i: (i, 0)),
            # Constant block index: M is DMA'd once and stays resident; each
            # TensorCore gets its own copy (safe under "parallel" on v7x).
            pl.BlockSpec((K, N), lambda i: (0, 0)),
        ],
        out_specs=pl.BlockSpec((TR, N), lambda i: (i, 0)),
        compiler_params=pltpu.CompilerParams(
            dimension_semantics=("parallel",),   # v7x: rows split across 2 TCs
            vmem_limit_bytes=vmem_limit,
        ),
    )(x2, m)
    # Free reshape back to NCHW.
    return out2.reshape(B, C, H * S, W * S)


if __name__ == "__main__":
    def _ref(x, s):
        B, C, H, W = x.shape
        return jnp.broadcast_to(
            x[:, :, :, None, :, None], (B, C, H, s, W, s)
        ).reshape(B, C, H * s, W * s)

    # Primary case (shape consistent with the module): K = 128, N = 512.
    key = jax.random.PRNGKey(0)
    B, C, H, W, stride = 2, 4, 16, 16, 2
    x = jax.random.normal(key, (B, C, H, W), dtype=jnp.float32)
    out = jax.block_until_ready(upsample(x, stride=stride))
    assert out.shape == (B, C, H * stride, W * stride)
    assert out.dtype == x.dtype
    np.testing.assert_array_equal(np.asarray(out), np.asarray(_ref(x, stride)))

    # bf16 path (no forced f32 epilogue), K not 128-alignable -> N % 128 == 0.
    xb = jax.random.normal(jax.random.PRNGKey(1), (2, 4, 8, 8), dtype=jnp.bfloat16)
    outb = jax.block_until_ready(upsample(xb, stride=2))
    np.testing.assert_array_equal(
        np.asarray(outb, dtype=np.float32),
        np.asarray(_ref(xb, 2), dtype=np.float32),
    )

    # Odd plane / odd stride (full-dim, non-128-aligned lane blocks).
    xo = jax.random.normal(jax.random.PRNGKey(2), (1, 2, 6, 10), dtype=jnp.float32)
    outo = jax.block_until_ready(upsample(xo, stride=3))
    np.testing.assert_array_equal(np.asarray(outo), np.asarray(_ref(xo, 3)))

    print("KERNEL_OK")
</pallas_src>

<mosaic_0001>
module attributes {stable_mosaic.version = 11 : i64} {
  func.func @_upsample_kernel(%arg0: i32, %arg1: memref<8x128xf32, #tpu.memory_space<vmem>>, %arg2: memref<128x512xf32, #tpu.memory_space<vmem>>, %arg3: memref<8x512xf32, #tpu.memory_space<vmem>>) attributes {dimension_semantics = [#tpu.dimension_semantics<parallel>], iteration_bounds = array<i64: 2>, scalar_prefetch = 0 : i64, scratch_operands = 0 : i64, tpu.core_type = #tpu.core_type<tc>, window_params = [{transform_indices = @transform_0, window_bounds = array<i64: 8, 128>}, {pipeline_mode = #tpu.pipeline_mode<synchronous>, transform_indices = @transform_1, window_bounds = array<i64: 128, 512>}, {transform_indices = @transform_2, window_bounds = array<i64: 8, 512>}]} {
    %c0 = arith.constant 0 : index
    %c0_0 = arith.constant 0 : index
    %0 = vector.load %arg1[%c0, %c0_0] : memref<8x128xf32, #tpu.memory_space<vmem>>, vector<8x128xf32>
    %c0_1 = arith.constant 0 : index
    %c0_2 = arith.constant 0 : index
    %1 = vector.load %arg2[%c0_1, %c0_2] : memref<128x512xf32, #tpu.memory_space<vmem>>, vector<128x512xf32>
    %cst = arith.constant dense<0.000000e+00> : vector<8x512xf32>
    %2 = tpu.matmul %0, %1, %cst {dimension_numbers = #tpu.dot_dimension_numbers<[1], [0], [0], [1], [0, 0, 1, 1], [], []>} : vector<8x128xf32>, vector<128x512xf32>, vector<8x512xf32> -> vector<8x512xf32>
    %c0_3 = arith.constant 0 : index
    %c0_4 = arith.constant 0 : index
    %3 = vector.load %arg3[%c0_3, %c0_4] : memref<8x512xf32, #tpu.memory_space<vmem>>, vector<8x512xf32>
    tpu.vector_store %arg3[%c0_3, %c0_4], %2 {strides = array<i32>} : memref<8x512xf32, #tpu.memory_space<vmem>>, vector<8x512xf32>,
    return
  }
  func.func @transform_0(%arg0: i32) -> (i32, i32) {
    %c0_i32 = arith.constant 0 : i32
    %c0_i32_0 = arith.constant 0 : i32
    return %arg0, %c0_i32 : i32, i32
  }
  func.func @transform_1(%arg0: i32) -> (i32, i32) {
    %c0_i32 = arith.constant 0 : i32
    %c0_i32_0 = arith.constant 0 : i32
    %c0_i32_1 = arith.constant 0 : i32
    return %c0_i32, %c0_i32_0 : i32, i32
  }
  func.func @transform_2(%arg0: i32) -> (i32, i32) {
    %c0_i32 = arith.constant 0 : i32
    %c0_i32_0 = arith.constant 0 : i32
    return %arg0, %c0_i32 : i32, i32
  }
}

</mosaic_0001>

<bundles_post_ra>
// kernel: tpu_custom_call.1
= control target key start
LH: loop header
LB: loop body
LE: loop exit
PB: predicated region body
PF: predicated region fallthrough
CT: control target
= control target key end

     0   :  { %7 = vsyncpa [#allocation3], 0  ;;  %s871_s0 = inlined_call_operand.hbm [shape: f32[16,128], index: 0, kind: input, shape index: {}]   ;;  %s872_s1 = inlined_call_operand.hbm [shape: f32[128,512], index: 1, kind: input, shape index: {}]   ;;  %s873_s2 = inlined_call_operand.hbm [shape: f32[16,512], index: 2, kind: output, shape index: {}]  }
   0x1   :  { %9 = vsyncpa [#allocation3 + $0x1], 0 }
   0x2   :  { %10 = vsyncpa [#allocation6], 0 }
   0x3   :  { %11 = vsyncpa [#allocation4], 0 }
   0x4   :  { %13 = vsyncpa [#allocation4 + $0x1], 0  ;;  %s701_s9 = smov 0   ;;  %s703_s10 = smov 0  }
   0x5   :  { %s705_s11 = smov 0   ;;  %s707_s12 = smov 0  }
   0x6 LB: > { %s722_s13 = sadd.s32 4294967295, %s678_s12   ;;  %s480_s14 = sadd.s32 4294967294, %s678_s12   ;;  %s678_s12 = sphi %s707_s12, %s895_s12   ;;  %s674_s11 = sphi %s705_s11, %s894_s11   ;;  %s670_s10 = sphi %s703_s10, %s893_s10   ;;  %s666_s9 = sphi %s701_s9, %s892_s9  }
   0x7   : > { %p39_p0 = scmp.ne.s32.totalorder %s670_s10, %s666_s9  ;;  %p874_p1 = scmp.eq.s32.totalorder %s722_s13, 0 }
   0x8   : > { %p90_p3 = scmp.eq.s32.totalorder %s480_s14, 1  ;;  %p481_p5 = scmp.ge.s32.totalorder %s678_s12, 1 }
   0x9   : > { %p731_p4 = por %p874_p1, %p39_p0  ;;  %p97_p7 = scmp.lt.s32.totalorder %s678_s12, 3 }
   0xa   : > { %p736_p6 = por %p90_p3, %p39_p0  ;;  %s680_s18 = smov [#allocation5]  }
   0xb   : > { %s878_s15 = scalar_select %p731_p4, 1, 0 }
   0xc   : > { %s879_s16 = scalar_select %p736_p6, 1, 0 }
   0xd   : > { %p741_p8 = pnand %p481_p5, %p97_p7  ;;  %s109_s19 = sshll.u32 %s680_s18, 4  ;;  %s110_s19 = int_to_ptr.vmem [resolvable:$true] %s109_s19 }
   0xe   : > { %s755_s21 = sadd.s32 1, %s678_s12   ;;  %s26_s22 = sadd.s32 1, %s674_s11 }
   0xf   : > { %s880_s17 = scalar_select %p741_p8, 1, 0 }
  0x10   : > { %p504_p9 = pneg %p741_p8  ;;  %s23_s23 = ssub.s32 %s678_s12, %s755_s21 }
  0x11   : > { %s567_s24 = scalar_lea.vmem %s110_s19, 8192  ;;  %p575_p5 = scmp.lt.s32.totalorder %s110_s19, %s110_s19 }
  0x12   : > { %p750_p11 = pnand %p504_p9, %p874_p1  ;;  %p568_p13 = scmp.ne.s32.totalorder %s110_s19, %s567_s24 }
  0x13   : > { %p576_p7 = scmp.lt.s32.totalorder %s567_s24, %s567_s24 }
  0x14   : > { %p558_p12 = pneg %p750_p11 }
  0x15   : > { %p577_p10 = por %p576_p7, %p575_p5 }
  0x16   : > { %p570_p0 = pnand %p568_p13, %p558_p12 }
  0x18   : > { %p571_p3 = pneg %p570_p0 }
  0x1a   : > { %p578_p2 = pnand %p577_p10, %p571_p3 }
  0x1c   : > { %581 = shalt.err (!%p578_p2)
}
  0x1d   : > { %s681_s25 = smov 512   ;;  %s682_s26 = smov 32  }
  0x1e   : > { %507 = dma.hbm_to_vmem [thread:$0]  (!%p750_p11), %s872_s1, 8192, %s110_s19, [#allocation6], %s681_s25, %s681_s25, %s682_s26  }
  0x1f   : > { %p24_p9 = scmp.eq.s32.totalorder %s23_s23, 0  ;;  %p33_p12 = scmp.ne.s32.totalorder %s674_s11, %s670_s10 }
  0x20   : > { %p34_p10 = scmp.eq.s32.totalorder %s678_s12, 0  ;;  %p517_p2 = scmp.lt.s32.totalorder %s678_s12, 2 }
  0x21   : > { %s772_s29 = scalar_select %p24_p9, %s674_s11, %s26_s22  }
  0x22   : > { %p35_p13 = por %p34_p10, %p33_p12  ;;  %p882_p0 = scmp.eq.s32.totalorder %s722_s13, 1 }
  0x23   : > { %s123_s3 = sand.u32 1, %s674_s11   ;;  %s485_s4 = sshll.u32 %s678_s12, 7 }
  0x24   : > { %p776_p3 = por %p882_p0, %p33_p12  ;;  %s484_s5 = sshll.u32 %s123_s3, 3 }
  0x25   : > { %s785_s8 = scalar_lea.hbm %s871_s0, %s485_s4  ;;  %s127_s14 = scalar_lea.vmem [#allocation2], %s484_s5 }
  0x26   : > { %s883_s30 = scalar_select %p776_p3, 1, 0 }
  0x27   : > { %s134_s18 = sshll.u32 %s127_s14, 4  ;;  %p787_p11 = pnand %p517_p2, %p35_p13  ;;  %s135_s18 = int_to_ptr.vmem [resolvable:$true] %s134_s18 }
  0x28   : > { %s124_s20 = scalar_lea.sflag [#allocation3], %s123_s3  ;;  %s582_s22 = scalar_lea.hbm %s785_s8, 128 }
  0x29   : > { %p583_p5 = scmp.ne.s32.totalorder %s785_s8, %s582_s22  ;;  %p584_p7 = pneg %p787_p11 }
  0x2a   : > { %s587_s25 = scalar_lea.hbm %s871_s0, 256  ;;  %p588_p10 = scmp.lt.s32.totalorder %s785_s8, %s871_s0 }
  0x2b   : > { %p585_p9 = pnand %p584_p7, %p583_p5  ;;  %p589_p2 = scmp.lt.s32.totalorder %s587_s25, %s582_s22 }
  0x2d   : > { %p586_p12 = pneg %p585_p9  ;;  %p590_p13 = por %p589_p2, %p588_p10 }
  0x2f   : > { %p591_p0 = pnand %p590_p13, %p586_p12 }
  0x31   : > { %594 = shalt.err (!%p591_p0)
}
  0x32   : > { %s595_s28 = scalar_lea.vmem %s135_s18, 128  ;;  %s683_s3 = smov [#allocation2]  }
  0x33   : > { %p596_p1 = scmp.ne.s32.totalorder %s135_s18, %s595_s28  ;;  %s600_s4 = sshll.u32 %s683_s3, 4  ;;  %s601_s4 = int_to_ptr.vmem [resolvable:$false] %s600_s4 }
  0x34   : > { %s602_s5 = scalar_lea.vmem %s601_s4, 256  ;;  %p603_p5 = scmp.lt.s32.totalorder %s135_s18, %s601_s4 }
  0x35   : > { %p598_p6 = pnand %p596_p1, %p584_p7  ;;  %p604_p9 = scmp.lt.s32.totalorder %s602_s5, %s595_s28 }
  0x37   : > { %p599_p3 = pneg %p598_p6  ;;  %p605_p4 = por %p604_p9, %p603_p5 }
  0x39   : > { %p606_p8 = pnand %p605_p4, %p599_p3 }
  0x3b   : > { %609 = shalt.err (!%p606_p8)
}
  0x3c   : > { %511 = dma.hbm_to_vmem [thread:$0]  (!%p787_p11), %s785_s8, 128, %s135_s18, %s124_s20  }
  0x3d   : > { %p885_p12 = scmp.ne.s32.totalorder %s880_s17, 0 }
  0x3e   : > { %s808_s6 = sand.u32 (!%p885_p12), 1, %s670_s10   ;;  %p886_p1 = scmp.ne.s32.totalorder (!%p885_p12), %s878_s15, 0 }
  0x3f   : > { %143 = sbr.rel (%p885_p12) target bundleno = 314 (0x13a), region = 28  ;;  %s487_s7 = sshll.u32 (!%p885_p12), %s808_s6, 3 }
  0x40   : > { %s146_s14 = scalar_lea.sflag (!%p885_p12), [#allocation3], %s808_s6  ;;  %s812_s22 = scalar_lea.vmem (!%p885_p12), [#allocation2], %s487_s7 }
  0x44   : > { %653 = dma.done.wait (%p886_p1), %s146_s14, 128  }
  0x45   : > { %655 = vsyncadd (%p886_p1), %s146_s14, 4294967168  ;;  %p887_p4 = scmp.eq.s32.totalorder %s722_s13, 0 }
  0x47   : > { %657 = dma.done.wait (%p887_p4), [#allocation6], 8192   ;;  %p888_p6 = pmov %p887_p4 }
  0x48   : > { %v684_v0 = vmov 0.0   ;;  %v236_v1 = vld [vmem:[#allocation5 + $0x1e8] sm:$0xff]  ;;  %v238_v2 = vld [vmem:[#allocation5 + $0x1f8] sm:$0xff]  ;;  %v235_v3 = vld [vmem:[#allocation5 + $0x1e0] sm:$0xff]  ;;  %s489_s15 = sshll.u32 %s808_s6, 5  ;;  %s495_s18 = sshll.u32 %s722_s13, 9 }
  0x49   : > { %659 = vsyncadd (%p888_p6), [#allocation6], 4294959104  ;;  %303 = vmatprep.mubr.f32.mxu0 %v684_v0  ;;  %374 = vmatprep.mubr.f32.mxu1 %v684_v0  ;;  %v237_v4 = vld [vmem:[#allocation5 + $0x1f0] sm:$0xff]  ;;  %v232_v5 = vld [vmem:[#allocation5 + $0x1c8] sm:$0xff]  ;;  %s173_s17 = scalar_lea.vmem [#allocation7], %s489_s15  ;;  %s830_s23 = scalar_lea.hbm %s873_s2, %s495_s18 }
  0x4a   : > { %239 = vmatprep.subr.mxu0 %v236_v1  ;;  %310 = vmatprep.subr.mxu1 %v238_v2  ;;  %v234_v6 = vld [vmem:[#allocation5 + $0x1d8] sm:$0xff]  ;;  %v231_v7 = vld [vmem:[#allocation5 + $0x1c0] sm:$0xff]  ;;  %v233_v8 = vld [vmem:[#allocation5 + $0x1d0] sm:$0xff]  ;;  %s400_s8 = sshll.u32 %s173_s17, 4  ;;  %s386_s24 = scalar_lea.sflag [#allocation4], %s808_s6  ;;  %s825_s8 = int_to_ptr.vmem [resolvable:$true] %s400_s8 }
  0x4b   : > { %240 = vmatpush1.msra.mxu0 %v235_v3  ;;  %311 = vmatpush1.msra.mxu1 %v237_v4  ;;  %v228_v9 = vld [vmem:[#allocation5 + $0x1a8] sm:$0xff]  ;;  %v230_v10 = vld [vmem:[#allocation5 + $0x1b8] sm:$0xff]  ;;  %v227_v11 = vld [vmem:[#allocation5 + $0x1a0] sm:$0xff]  ;;  %s610_s13 = scalar_lea.vmem %s825_s8, 512  ;;  %p889_p3 = scmp.ne.s32.totalorder %s883_s30, 0 }
  0x4c   : > { %241 = vmatprep.subr.mxu0 %v232_v5  ;;  %312 = vmatprep.subr.mxu1 %v234_v6  ;;  %v229_v12 = vld [vmem:[#allocation5 + $0x1b0] sm:$0xff]  ;;  %v224_v13 = vld [vmem:[#allocation5 + $0x188] sm:$0xff]  ;;  %v226_v14 = vld [vmem:[#allocation5 + $0x198] sm:$0xff]  ;;  %p611_p8 = scmp.ne.s32.totalorder %s825_s8, %s610_s13  ;;  %s685_s25 = smov [#allocation7]  }
  0x4d   : > { %242 = vmatpush1.msra.mxu0 %v231_v7  ;;  %313 = vmatpush1.msra.mxu1 %v233_v8  ;;  %v223_v15 = vld [vmem:[#allocation5 + $0x180] sm:$0xff]  ;;  %v225_v16 = vld [vmem:[#allocation5 + $0x190] sm:$0xff]  ;;  %v220_v17 = vld [vmem:[#allocation5 + $0x168] sm:$0xff]  ;;  %s614_s26 = sshll.u32 %s685_s25, 4  ;;  %s615_s26 = int_to_ptr.vmem [resolvable:$false] %s614_s26 }
  0x4e   : > { %243 = vmatprep.subr.mxu0 %v228_v9  ;;  %314 = vmatprep.subr.mxu1 %v230_v10  ;;  %v222_v18 = vld [vmem:[#allocation5 + $0x178] sm:$0xff]  ;;  %v219_v19 = vld [vmem:[#allocation5 + $0x160] sm:$0xff]  ;;  %v221_v20 = vld [vmem:[#allocation5 + $0x170] sm:$0xff]  ;;  %p612_p11 = pnand %p611_p8, %p889_p3  ;;  %s616_s27 = scalar_lea.vmem %s615_s26, 1024 }
  0x4f   : > { %244 = vmatpush1.msra.mxu0 %v227_v11  ;;  %315 = vmatpush1.msra.mxu1 %v229_v12  ;;  %v216_v21 = vld [vmem:[#allocation5 + $0x148] sm:$0xff]  ;;  %v218_v22 = vld [vmem:[#allocation5 + $0x158] sm:$0xff]  ;;  %v215_v23 = vld [vmem:[#allocation5 + $0x140] sm:$0xff]  ;;  %p617_p10 = scmp.lt.s32.totalorder %s825_s8, %s615_s26  ;;  %p618_p2 = scmp.lt.s32.totalorder %s616_s27, %s610_s13 }
  0x50   : > { %245 = vmatprep.subr.mxu0 %v224_v13  ;;  %316 = vmatprep.subr.mxu1 %v226_v14  ;;  %v217_v24 = vld [vmem:[#allocation5 + $0x150] sm:$0xff]  ;;  %v212_v25 = vld [vmem:[#allocation5 + $0x128] sm:$0xff]  ;;  %v214_v26 = vld [vmem:[#allocation5 + $0x138] sm:$0xff]  ;;  %p613_p7 = pneg %p612_p11 }
  0x51   : > { %246 = vmatpush1.msra.mxu0 %v223_v15  ;;  %317 = vmatpush1.msra.mxu1 %v225_v16  ;;  %v211_v27 = vld [vmem:[#allocation5 + $0x120] sm:$0xff]  ;;  %v213_v28 = vld [vmem:[#allocation5 + $0x130] sm:$0xff]  ;;  %v208_v29 = vld [vmem:[#allocation5 + $0x108] sm:$0xff]  ;;  %p619_p13 = por %p618_p2, %p617_p10 }
  0x52   : > { %247 = vmatprep.subr.mxu0 %v220_v17  ;;  %318 = vmatprep.subr.mxu1 %v222_v18  ;;  %v210_v30 = vld [vmem:[#allocation5 + $0x118] sm:$0xff]  ;;  %v207_v31 = vld [vmem:[#allocation5 + $0x100] sm:$0xff]  ;;  %v209_v32 = vld [vmem:[#allocation5 + $0x110] sm:$0xff] }
  0x53   : > { %248 = vmatpush1.msra.mxu0 %v219_v19  ;;  %319 = vmatpush1.msra.mxu1 %v221_v20  ;;  %v204_v33 = vld [vmem:[#allocation5 + $0xe8] sm:$0xff]  ;;  %v206_v34 = vld [vmem:[#allocation5 + $0xf8] sm:$0xff]  ;;  %v203_v35 = vld [vmem:[#allocation5 + $0xe0] sm:$0xff]  ;;  %p620_p0 = pnand %p619_p13, %p613_p7 }
  0x54   : > { %249 = vmatprep.subr.mxu0 %v216_v21  ;;  %320 = vmatprep.subr.mxu1 %v218_v22  ;;  %v205_v36 = vld [vmem:[#allocation5 + $0xf0] sm:$0xff]  ;;  %v200_v37 = vld [vmem:[#allocation5 + $0xc8] sm:$0xff]  ;;  %v202_v38 = vld [vmem:[#allocation5 + $0xd8] sm:$0xff] }
  0x55   : > { %250 = vmatpush1.msra.mxu0 %v215_v23  ;;  %321 = vmatpush1.msra.mxu1 %v217_v24  ;;  %v199_v39 = vld [vmem:[#allocation5 + $0xc0] sm:$0xff]  ;;  %v201_v40 = vld [vmem:[#allocation5 + $0xd0] sm:$0xff]  ;;  %v196_v41 = vld [vmem:[#allocation5 + $0xa8] sm:$0xff] }
  0x56   : > { %251 = vmatprep.subr.mxu0 %v212_v25  ;;  %322 = vmatprep.subr.mxu1 %v214_v26  ;;  %v198_v42 = vld [vmem:[#allocation5 + $0xb8] sm:$0xff]  ;;  %v195_v43 = vld [vmem:[#allocation5 + $0xa0] sm:$0xff]  ;;  %v197_v44 = vld [vmem:[#allocation5 + $0xb0] sm:$0xff] }
  0x57   : > { %252 = vmatpush1.msra.mxu0 %v211_v27  ;;  %323 = vmatpush1.msra.mxu1 %v213_v28  ;;  %v192_v45 = vld [vmem:[#allocation5 + $0x88] sm:$0xff]  ;;  %v194_v46 = vld [vmem:[#allocation5 + $0x98] sm:$0xff]  ;;  %v191_v47 = vld [vmem:[#allocation5 + $0x80] sm:$0xff] }
  0x58   : > { %253 = vmatprep.subr.mxu0 %v208_v29  ;;  %324 = vmatprep.subr.mxu1 %v210_v30  ;;  %v193_v48 = vld [vmem:[#allocation5 + $0x90] sm:$0xff]  ;;  %v188_v49 = vld [vmem:[#allocation5 + $0x68] sm:$0xff]  ;;  %v190_v50 = vld [vmem:[#allocation5 + $0x78] sm:$0xff] }
  0x59   : > { %254 = vmatpush1.msra.mxu0 %v207_v31  ;;  %325 = vmatpush1.msra.mxu1 %v209_v32  ;;  %v187_v51 = vld [vmem:[#allocation5 + $0x60] sm:$0xff]  ;;  %v189_v52 = vld [vmem:[#allocation5 + $0x70] sm:$0xff]  ;;  %v184_v53 = vld [vmem:[#allocation5 + $0x48] sm:$0xff] }
  0x5a   : > { %255 = vmatprep.subr.mxu0 %v204_v33  ;;  %326 = vmatprep.subr.mxu1 %v206_v34  ;;  %v186_v54 = vld [vmem:[#allocation5 + $0x58] sm:$0xff]  ;;  %v183_v55 = vld [vmem:[#allocation5 + $0x40] sm:$0xff]  ;;  %v185_v56 = vld [vmem:[#allocation5 + $0x50] sm:$0xff] }
  0x5b   : > { %256 = vmatpush1.msra.mxu0 %v203_v35  ;;  %327 = vmatpush1.msra.mxu1 %v205_v36  ;;  %v180_v57 = vld [vmem:[#allocation5 + $0x28] sm:$0xff]  ;;  %v182_v58 = vld [vmem:[#allocation5 + $0x38] sm:$0xff]  ;;  %v179_v59 = vld [vmem:[#allocation5 + $0x20] sm:$0xff] }
  0x5c   : > { %257 = vmatprep.subr.mxu0 %v200_v37  ;;  %328 = vmatprep.subr.mxu1 %v202_v38  ;;  %v181_v60 = vld [vmem:[#allocation5 + $0x30] sm:$0xff]  ;;  %v176_v61 = vld [vmem:[#allocation5 + $0x8] sm:$0xff]  ;;  %v178_v62 = vld [vmem:[#allocation5 + $0x18] sm:$0xff] }
  0x5d   : > { %258 = vmatpush1.msra.mxu0 %v199_v39  ;;  %329 = vmatpush1.msra.mxu1 %v201_v40  ;;  %v175_v63 = vld [vmem:[#allocation5] sm:$0xff]  ;;  %v177_v0 = vld [vmem:[#allocation5 + $0x10] sm:$0xff] }
  0x5e   : > { %259 = vmatprep.subr.mxu0 %v196_v41  ;;  %330 = vmatprep.subr.mxu1 %v198_v42  ;;  %v174_v1 = vld [vmem:[%s812_s22] sm:$0xff] }
  0x5f   : > { %260 = vmatpush1.msra.mxu0 %v195_v43  ;;  %331 = vmatpush1.msra.mxu1 %v197_v44 }
  0x60   : > { %261 = vmatprep.subr.mxu0 %v192_v45  ;;  %332 = vmatprep.subr.mxu1 %v194_v46 }
  0x61   : > { %262 = vmatpush1.msra.mxu0 %v191_v47  ;;  %333 = vmatpush1.msra.mxu1 %v193_v48 }
  0x62   : > { %263 = vmatprep.subr.mxu0 %v188_v49  ;;  %334 = vmatprep.subr.mxu1 %v190_v50 }
  0x63   : > { %264 = vmatpush1.msra.mxu0 %v187_v51  ;;  %335 = vmatpush1.msra.mxu1 %v189_v52 }
  0x64   : > { %265 = vmatprep.subr.mxu0 %v184_v53  ;;  %336 = vmatprep.subr.mxu1 %v186_v54 }
  0x65   : > { %266 = vmatpush1.msra.mxu0 %v183_v55  ;;  %337 = vmatpush1.msra.mxu1 %v185_v56 }
  0x66   : > { %267 = vmatprep.subr.mxu0 %v180_v57  ;;  %338 = vmatprep.subr.mxu1 %v182_v58 }
  0x67   : > { %268 = vmatpush1.msra.mxu0 %v179_v59  ;;  %339 = vmatpush1.msra.mxu1 %v181_v60 }
  0x68   : > { %269 = vmatprep.subr.mxu0 %v176_v61  ;;  %340 = vmatprep.subr.mxu1 %v178_v62 }
  0x69   : > { %270 = vmatpush1.msra.mxu0 %v175_v63  ;;  %341 = vmatpush1.msra.mxu1 %v177_v0 }
  0x6a   : > { %304 = vmatmul.mubr.f32.vlgmr.msra.gmra.mxu0 %v174_v1  ;;  %375 = vmatmul.mubr.f32.vlgmr.msra.gmra.mxu1 %v174_v1 }
 0x12a   : > { %v305_v2 = vpop.f32.mrf.mxu0  ;;  %v376_v3 = vpop.f32.mrf.mxu1 }
 0x12b   : > { %381 = vst [vmem:[%s173_s17] sm:$0xff] %v305_v2  ;;  %383 = vst [vmem:[%s173_s17 + $0x10] sm:$0xff] %v376_v3 }
 0x12c   : > { %v307_v4 = vpop.f32.mrf.mxu0  ;;  %v378_v5 = vpop.f32.mrf.mxu1 }
 0x12d   : > { %382 = vst [vmem:[%s173_s17 + $0x8] sm:$0xff] %v307_v4  ;;  %384 = vst [vmem:[%s173_s17 + $0x18] sm:$0xff] %v378_v5 }
 0x12e   : > { %623 = shalt.err (!%p620_p0)
}
 0x12f   : > { %s624_s28 = scalar_lea.hbm %s830_s23, 512  ;;  %s628_s5 = scalar_lea.hbm %s873_s2, 1024 }
 0x130   : > { %p625_p5 = scmp.ne.s32.totalorder %s830_s23, %s624_s28  ;;  %p629_p1 = scmp.lt.s32.totalorder %s830_s23, %s873_s2 }
 0x131   : > { %p630_p4 = scmp.lt.s32.totalorder %s628_s5, %s624_s28 }
 0x132   : > { %p626_p9 = pnand %p625_p5, %p889_p3 }
 0x133   : > { %p631_p6 = por %p630_p4, %p629_p1 }
 0x134   : > { %p627_p12 = pneg %p626_p9 }
 0x136   : > { %p632_p8 = pnand %p631_p6, %p627_p12 }
 0x138   : > { %635 = shalt.err (!%p632_p8)
}
 0x139   : > { %502 = dma.vmem_to_hbm [thread:$0]  (%p889_p3), %s825_s8, 512, %s830_s23, %s386_s24  }
 0x13a PF: > { %s412_s14 = sand.u32 1, %s666_s9   ;;  %p890_p11 = scmp.ne.s32.totalorder %s879_s16, 0 }
 0x13b   : > { %p891_p7 = scmp.ge.s32.totalorder %s678_s12, 2  ;;  %s413_s22 = scalar_lea.sflag [#allocation4], %s412_s14 }
 0x13d   : > { %p513_p10 = pnand %p891_p7, %p890_p11 }
 0x13f   : > { %p514_p2 = pneg %p513_p10 }
 0x141   : > { %661 = dma.done.wait (%p514_p2), %s413_s22, 512  }
 0x142   : > { %663 = vsyncadd (%p514_p2), %s413_s22, 4294966784  ;;  %p16_p13 = scmp.ge.s32.totalorder %s755_s21, 4   ;;  %s892_s9 = smov %s670_s10 }
 0x143   : > { %s893_s10 = smov %s674_s11  ;;  %s894_s11 = smov %s772_s29 }
 0x144   : > { %s895_s12 = smov %s755_s21  ;;  %18 = sbr.rel (!%p16_p13) target bundleno = 6 (0x6), region = 77 }
 0x149   :  { %418 = vsyncpa [#allocation3], 1 }
 0x14a   :  { %420 = vsyncpa [#allocation3 + $0x1], 1 }
 0x14b   :  { %421 = vsyncpa [#allocation6], 1 }
 0x14c   :  { %422 = vsyncpa [#allocation4], 1 }
 0x14d   :  { %424 = vsyncpa [#allocation4 + $0x1], 1 }

</bundles_post_ra>
